<compile_context>
chip_gen: v6e
topology: v6e:2x2x1
jax: 0.10.0
libtpu: 0.0.40
codegen_flags: <defaults>
</compile_context>

<pallas_src>
import functools

import jax
import jax.numpy as jnp
import numpy as np
from jax import lax
from jax.experimental import pallas as pl
from jax.experimental.pallas import tpu as pltpu

EPS = 1e-5


def _vmem_limit_bytes(S, E, H, hd, return_attn):
    f32, bf16 = 4, 2
    t = 0
    t += 2 * (2 * S * E * f32)                      # x + out row blocks (dbl-buffered)
    if return_attn:
        t += 2 * S * S * f32                        # attn row block
    t += 2 * H * (E * 3 * hd + hd * E) * bf16       # resident weight stacks (+slack)
    t += S * E * bf16                               # LayerNorm scratch
    t += 6 * S * S * f32                            # score / exp / prob temporaries
    t += (S * 3 * hd + 2 * S * E + 8 * E) * f32     # qkv / context / bias temporaries
    t += 4 << 20                                    # headroom
    # clamp to 64 MiB so the limit is valid on v7x as well as v5e/v6e
    return int(min(max(t, 32 << 20), 64 << 20))


def _encoder_layer_kernel(x_ref, g_ref, b_ref, wqkv_ref, bqkv_ref, wo_ref,
                          bo_ref, fg_ref, fb_ref, *refs,
                          num_heads, head_dim, apply_final_norm, return_attn):
    """Grid = (batch, head).  One head of pre-LN self-attention per step,
    accumulated into the resident residual/output block."""
    if return_attn:
        out_ref, attn_ref, y_scr = refs
    else:
        out_ref, y_scr = refs
        attn_ref = None

    head = pl.program_id(1)
    hd = head_dim

    # ---- head == 0: pre-LayerNorm once per batch block; init residual / attn ----
    @pl.when(head == 0)
    def _():
        x = x_ref[0].astype(jnp.float32)                              # (S, E)
        mu = jnp.mean(x, axis=-1, keepdims=True)
        var = jnp.mean(jnp.square(x - mu), axis=-1, keepdims=True)
        y = (x - mu) * lax.rsqrt(var + EPS)
        y_scr[...] = (y * g_ref[...] + b_ref[...]).astype(jnp.bfloat16)
        out_ref[0] = x + bo_ref[...]          # residual + out-proj bias, added once
        if return_attn:
            attn_ref[...] = jnp.zeros_like(attn_ref)

    y = y_scr[...]                                                    # (S, E) bf16

    # ---- this head's QKV projection (1/sqrt(hd) folded into W_q/b_q at prep) ----
    qkv = jnp.dot(y, wqkv_ref[head], preferred_element_type=jnp.float32)
    qkv = qkv + bqkv_ref[head]                                        # (S, 3*hd) f32
    q = qkv[:, 0:hd].astype(jnp.bfloat16)
    k = qkv[:, hd:2 * hd].astype(jnp.bfloat16)
    v = qkv[:, 2 * hd:3 * hd].astype(jnp.bfloat16)

    # ---- scores + softmax statistics (f32) ----
    s = lax.dot_general(q, k, (((1,), (1,)), ((), ())),               # q @ k^T (MXU)
                        preferred_element_type=jnp.float32)           # (S, S)
    m = jnp.max(s, axis=-1, keepdims=True)
    p = jnp.exp(s - m)
    denom = jnp.sum(p, axis=-1, keepdims=True)

    if return_attn:
        p = p / denom                          # exact: weights are user-visible
        attn_ref[0] += p * (1.0 / num_heads)   # head-averaged attention weights
        ctx = jnp.dot(p.astype(jnp.bfloat16), v,
                      preferred_element_type=jnp.float32)             # (S, hd)
    else:
        # deferred softmax normalization: scale the (S, hd) context, not (S, S)
        ctx = jnp.dot(p.astype(jnp.bfloat16), v,
                      preferred_element_type=jnp.float32)
        ctx = ctx * pl.reciprocal(denom, approx=True)                 # EUP slot

    # ---- this head's slice of the output projection, accumulated in-place ----
    out_ref[0] += jnp.dot(ctx.astype(jnp.bfloat16), wo_ref[head],
                          preferred_element_type=jnp.float32)

    # ---- after the last head: Encoder's trailing LayerNorm (last layer only) ----
    if apply_final_norm:
        @pl.when(head == num_heads - 1)
        def _():
            o = out_ref[0]
            mu2 = jnp.mean(o, axis=-1, keepdims=True)
            var2 = jnp.mean(jnp.square(o - mu2), axis=-1, keepdims=True)
            o = (o - mu2) * lax.rsqrt(var2 + EPS)
            out_ref[0] = o * fg_ref[...] + fb_ref[...]


def _encoder_layer(x, layer_p, final_p, *, num_heads, apply_final_norm,
                   return_attn):
    gamma, beta, wqkv_h, bqkv_h, wo_h, bo = layer_p
    fg, fb = final_p
    B, S, E = x.shape
    hd = E // num_heads

    kernel = functools.partial(
        _encoder_layer_kernel, num_heads=num_heads, head_dim=hd,
        apply_final_norm=apply_final_norm, return_attn=return_attn)

    row_map = lambda b, h: (b, 0, 0)          # streamed per batch block
    const2 = lambda b, h: (0, 0)              # VMEM-resident (fetched once)
    const3 = lambda b, h: (0, 0, 0)

    in_specs = [
        pl.BlockSpec((1, S, E), row_map),                    # x
        pl.BlockSpec((1, E), const2),                        # ln gamma
        pl.BlockSpec((1, E), const2),                        # ln beta
        pl.BlockSpec((num_heads, E, 3 * hd), const3),        # W_qkv (head-major)
        pl.BlockSpec((num_heads, 1, 3 * hd), const3),        # b_qkv (head-major)
        pl.BlockSpec((num_heads, hd, E), const3),            # W_out (head-major)
        pl.BlockSpec((1, E), const2),                        # b_out
        pl.BlockSpec((1, E), const2),                        # final ln gamma
        pl.BlockSpec((1, E), const2),                        # final ln beta
    ]

    if return_attn:
        out_shape = (jax.ShapeDtypeStruct((B, S, E), jnp.float32),
                     jax.ShapeDtypeStruct((B, S, S), jnp.float32))
        out_specs = (pl.BlockSpec((1, S, E), row_map),
                     pl.BlockSpec((1, S, S), row_map))
    else:
        out_shape = jax.ShapeDtypeStruct((B, S, E), jnp.float32)
        out_specs = pl.BlockSpec((1, S, E), row_map)

    outs = pl.pallas_call(
        kernel,
        out_shape=out_shape,
        grid=(B, num_heads),
        in_specs=in_specs,
        out_specs=out_specs,
        scratch_shapes=[pltpu.VMEM((S, E), jnp.bfloat16)],   # pre-LN activations
        compiler_params=pltpu.CompilerParams(
            dimension_semantics=("parallel", "arbitrary"),
            vmem_limit_bytes=_vmem_limit_bytes(S, E, num_heads, hd, return_attn)),
    )(x, gamma, beta, wqkv_h, bqkv_h, wo_h, bo, fg, fb)

    if return_attn:
        return outs[0], outs[1]
    return outs, None


@functools.partial(jax.jit, static_argnames=("num_heads", "return_attn_weights"))
def encoder_forward(x, layer_params, final_params, *, num_heads,
                    return_attn_weights=False):
    """Pallas Encoder forward.  x: (B, S, E).  Returns (normed_x, attn_stack|None)."""
    # TODO(synk): key_padding_mask / attn_mask are not supported (None in this setup).
    # TODO(synk): training-mode dropout (p > 0) would need pltpu.prng_* masking.
    x = x.astype(jnp.float32)
    n_layers = len(layer_params)
    attns = []
    for i, lp in enumerate(layer_params):
        x, attn = _encoder_layer(
            x, lp, final_params, num_heads=num_heads,
            apply_final_norm=(i == n_layers - 1),
            return_attn=return_attn_weights)
        if return_attn_weights:
            attns.append(attn)
    if return_attn_weights:
        return x, jnp.stack(attns, axis=0)
    return x, None


# -------- one-time parameter preparation (hoisted out of the hot path) --------
def prepare_layer_params(gamma, beta, w_in, b_in, w_out, b_out, num_heads):
    """PyTorch (out,in) weights -> head-major bf16 stacks; fold 1/sqrt(hd) into Q."""
    E = int(np.shape(gamma)[-1])
    hd = E // num_heads
    scale = 1.0 / float(hd) ** 0.5

    w_in = jnp.asarray(w_in, jnp.float32)                    # (3E, E)
    b_in = jnp.asarray(b_in, jnp.float32)                    # (3E,)
    w_in = w_in.at[:E, :].multiply(scale)                    # scale Q rows
    b_in = b_in.at[:E].multiply(scale)

    def split_w(w):      # (E_out, E_in) -> (H, E_in, hd) so q_h = y @ w[h]
        return w.reshape(num_heads, hd, E).transpose(0, 2, 1)

    def split_b(b):      # (E,) -> (H, 1, hd)
        return b.reshape(num_heads, 1, hd)

    wq, wk, wv = w_in[:E], w_in[E:2 * E], w_in[2 * E:]
    bq, bk, bv = b_in[:E], b_in[E:2 * E], b_in[2 * E:]
    wqkv_h = jnp.concatenate([split_w(wq), split_w(wk), split_w(wv)],
                             axis=-1).astype(jnp.bfloat16)   # (H, E, 3*hd)
    bqkv_h = jnp.concatenate([split_b(bq), split_b(bk), split_b(bv)],
                             axis=-1)                        # (H, 1, 3*hd) f32

    w_out = jnp.asarray(w_out, jnp.float32)                  # (E, E) (out, in)
    wo_h = w_out.T.reshape(num_heads, hd, E).astype(jnp.bfloat16)   # (H, hd, E)

    return (jnp.asarray(gamma, jnp.float32).reshape(1, E),
            jnp.asarray(beta, jnp.float32).reshape(1, E),
            wqkv_h, bqkv_h, wo_h,
            jnp.asarray(b_out, jnp.float32).reshape(1, E))


def prepare_final_norm(gamma, beta):
    return (jnp.asarray(gamma, jnp.float32).reshape(1, -1),
            jnp.asarray(beta, jnp.float32).reshape(1, -1))


# -------- pure-JAX reference (mirrors the PyTorch Encoder, eval mode) --------
def reference_encoder(x, raw_layers, final_gamma, final_beta, num_heads):
    B, S, E = x.shape
    hd = E // num_heads

    def layer_norm(t, g, b):
        mu = t.mean(-1, keepdims=True)
        var = ((t - mu) ** 2).mean(-1, keepdims=True)
        return (t - mu) / jnp.sqrt(var + EPS) * g + b

    attns = []
    for (g, b, w_in, b_in, w_out, b_out) in raw_layers:
        y = layer_norm(x, g, b)
        qkv = jnp.einsum('bse,fe->bsf', y, w_in) + b_in
        q, k, v = jnp.split(qkv, 3, axis=-1)
        q = q.reshape(B, S, num_heads, hd)
        k = k.reshape(B, S, num_heads, hd)
        v = v.reshape(B, S, num_heads, hd)
        s = jnp.einsum('bqhd,bkhd->bhqk', q, k) / jnp.sqrt(hd)
        p = jax.nn.softmax(s, axis=-1)
        o = jnp.einsum('bhqk,bkhd->bqhd', p, v).reshape(B, S, E)
        x = x + jnp.einsum('bse,fe->bsf', o, w_out) + b_out
        attns.append(p.mean(axis=1))
    return layer_norm(x, final_gamma, final_beta), jnp.stack(attns, axis=0)


if __name__ == "__main__":
    B, S, E, H, L = 2, 8, 32, 4, 2          # batch, seq, dim_embed, heads, layers
    key = jax.random.PRNGKey(0)

    x = jax.random.normal(jax.random.fold_in(key, 999), (B, S, E), jnp.float32)

    raw_layers, prepared_layers = [], []
    for layer_idx in range(L):
        ks = jax.random.split(jax.random.fold_in(key, layer_idx), 6)
        gamma = 1.0 + 0.1 * jax.random.normal(ks[0], (E,), jnp.float32)
        beta = 0.1 * jax.random.normal(ks[1], (E,), jnp.float32)
        w_in = 0.1 * jax.random.normal(ks[2], (3 * E, E), jnp.float32)   # in_proj_weight
        b_in = 0.1 * jax.random.normal(ks[3], (3 * E,), jnp.float32)     # in_proj_bias
        w_out = 0.1 * jax.random.normal(ks[4], (E, E), jnp.float32)      # out_proj.weight
        b_out = 0.1 * jax.random.normal(ks[5], (E,), jnp.float32)        # out_proj.bias
        raw_layers.append((gamma, beta, w_in, b_in, w_out, b_out))
        prepared_layers.append(
            prepare_layer_params(gamma, beta, w_in, b_in, w_out, b_out, H))

    final_gamma = jnp.ones((E,), jnp.float32)     # nn.LayerNorm default init
    final_beta = jnp.zeros((E,), jnp.float32)
    final_prepared = prepare_final_norm(final_gamma, final_beta)

    # return_attn_weights=True path
    out, attn = encoder_forward(x, tuple(prepared_layers), final_prepared,
                                num_heads=H, return_attn_weights=True)
    jax.block_until_ready((out, attn))

    out_ref, attn_ref = reference_encoder(x, raw_layers, final_gamma,
                                          final_beta, H)
    # bf16 MXU operands (+ approx EUP reciprocal on the no-attn path) -> looser tol.
    np.testing.assert_allclose(np.asarray(out), np.asarray(out_ref),
                               atol=3e-2, rtol=3e-2)
    np.testing.assert_allclose(np.asarray(attn), np.asarray(attn_ref),
                               atol=2e-2, rtol=2e-2)

    # return_attn_weights=False path (skips the (B,S,S) writeback entirely)
    out2, none_attn = encoder_forward(x, tuple(prepared_layers), final_prepared,
                                      num_heads=H, return_attn_weights=False)
    jax.block_until_ready(out2)
    assert none_attn is None
    np.testing.assert_allclose(np.asarray(out2), np.asarray(out_ref),
                               atol=3e-2, rtol=3e-2)

    print("KERNEL_OK")
</pallas_src>

<mosaic_0001>
module attributes {stable_mosaic.version = 11 : i64} {
  func.func @_encoder_layer_kernel(%arg0: i32, %arg1: i32, %arg2: memref<1x8x32xf32, #tpu.memory_space<vmem>>, %arg3: memref<1x32xf32, #tpu.memory_space<vmem>>, %arg4: memref<1x32xf32, #tpu.memory_space<vmem>>, %arg5: memref<4x32x24xbf16, #tpu.memory_space<vmem>>, %arg6: memref<4x1x24xf32, #tpu.memory_space<vmem>>, %arg7: memref<4x8x32xbf16, #tpu.memory_space<vmem>>, %arg8: memref<1x32xf32, #tpu.memory_space<vmem>>, %arg9: memref<1x32xf32, #tpu.memory_space<vmem>>, %arg10: memref<1x32xf32, #tpu.memory_space<vmem>>, %arg11: memref<1x8x32xf32, #tpu.memory_space<vmem>>, %arg12: memref<1x8x8xf32, #tpu.memory_space<vmem>>, %arg13: memref<8x32xbf16, #tpu.memory_space<vmem>>) attributes {dimension_semantics = [#tpu.dimension_semantics<parallel>, #tpu.dimension_semantics<arbitrary>], iteration_bounds = array<i64: 2, 4>, scalar_prefetch = 0 : i64, scratch_operands = 1 : i64, tpu.core_type = #tpu.core_type<tc>, window_params = [{transform_indices = @transform_0, window_bounds = array<i64: 1, 8, 32>}, {pipeline_mode = #tpu.pipeline_mode<synchronous>, transform_indices = @transform_1, window_bounds = array<i64: 1, 32>}, {pipeline_mode = #tpu.pipeline_mode<synchronous>, transform_indices = @transform_2, window_bounds = array<i64: 1, 32>}, {pipeline_mode = #tpu.pipeline_mode<synchronous>, transform_indices = @transform_3, window_bounds = array<i64: 4, 32, 24>}, {pipeline_mode = #tpu.pipeline_mode<synchronous>, transform_indices = @transform_4, window_bounds = array<i64: 4, 1, 24>}, {pipeline_mode = #tpu.pipeline_mode<synchronous>, transform_indices = @transform_5, window_bounds = array<i64: 4, 8, 32>}, {pipeline_mode = #tpu.pipeline_mode<synchronous>, transform_indices = @transform_6, window_bounds = array<i64: 1, 32>}, {pipeline_mode = #tpu.pipeline_mode<synchronous>, transform_indices = @transform_7, window_bounds = array<i64: 1, 32>}, {pipeline_mode = #tpu.pipeline_mode<synchronous>, transform_indices = @transform_8, window_bounds = array<i64: 1, 32>}, {transform_indices = @transform_9, window_bounds = array<i64: 1, 8, 32>}, {transform_indices = @transform_10, window_bounds = array<i64: 1, 8, 8>}]} {
    %c0_i32 = arith.constant 0 : i32
    %0 = arith.cmpi eq, %arg1, %c0_i32 : i32
    %1 = arith.extui %0 : i1 to i32
    %c0_i32_0 = arith.constant 0 : i32
    %2 = arith.cmpi ne, %1, %c0_i32_0 : i32
    scf.if %2 {
      %c0_27 = arith.constant 0 : index
      %c0_28 = arith.constant 0 : index
      %c0_29 = arith.constant 0 : index
      %53 = vector.load %arg2[%c0_27, %c0_28, %c0_29] : memref<1x8x32xf32, #tpu.memory_space<vmem>>, vector<1x8x32xf32>
      %54 = vector.shape_cast %53 : vector<1x8x32xf32> to vector<8x32xf32>
      %cst_30 = arith.constant dense<0.000000e+00> : vector<8xf32>
      %55 = vector.multi_reduction <add>, %54, %cst_30 [1] : vector<8x32xf32> to vector<8xf32>
      %56 = vector.shape_cast %55 : vector<8xf32> to vector<8x1xf32>
      %cst_31 = arith.constant 3.200000e+01 : f32
      %57 = vector.broadcast %cst_31 : f32 to vector<8x1xf32>
      %58 = arith.divf %56, %57 : vector<8x1xf32>
      %59 = vector.broadcast %58 : vector<8x1xf32> to vector<8x32xf32>
      %60 = arith.subf %54, %59 : vector<8x32xf32>
      %61 = arith.mulf %60, %60 : vector<8x32xf32>
      %cst_32 = arith.constant dense<0.000000e+00> : vector<8xf32>
      %62 = vector.multi_reduction <add>, %61, %cst_32 [1] : vector<8x32xf32> to vector<8xf32>
      %63 = vector.shape_cast %62 : vector<8xf32> to vector<8x1xf32>
      %cst_33 = arith.constant 3.200000e+01 : f32
      %64 = vector.broadcast %cst_33 : f32 to vector<8x1xf32>
      %65 = arith.divf %63, %64 : vector<8x1xf32>
      %66 = vector.broadcast %58 : vector<8x1xf32> to vector<8x32xf32>
      %67 = arith.subf %54, %66 : vector<8x32xf32>
      %cst_34 = arith.constant 9.99999974E-6 : f32
      %68 = vector.broadcast %cst_34 : f32 to vector<8x1xf32>
      %69 = arith.addf %65, %68 : vector<8x1xf32>
      %70 = math.rsqrt %69 : vector<8x1xf32>
      %71 = vector.broadcast %70 : vector<8x1xf32> to vector<8x32xf32>
      %72 = arith.mulf %67, %71 : vector<8x32xf32>
      %c0_35 = arith.constant 0 : index
      %c0_36 = arith.constant 0 : index
      %73 = vector.load %arg3[%c0_35, %c0_36] : memref<1x32xf32, #tpu.memory_space<vmem>>, vector<1x32xf32>
      %74 = vector.broadcast %73 : vector<1x32xf32> to vector<8x32xf32>
      %75 = arith.mulf %72, %74 : vector<8x32xf32>
      %c0_37 = arith.constant 0 : index
      %c0_38 = arith.constant 0 : index
      %76 = vector.load %arg4[%c0_37, %c0_38] : memref<1x32xf32, #tpu.memory_space<vmem>>, vector<1x32xf32>
      %77 = vector.broadcast %76 : vector<1x32xf32> to vector<8x32xf32>
      %78 = arith.addf %75, %77 : vector<8x32xf32>
      %79 = arith.truncf %78 : vector<8x32xf32> to vector<8x32xbf16>
      %c0_39 = arith.constant 0 : index
      %c0_40 = arith.constant 0 : index
      %80 = vector.load %arg13[%c0_39, %c0_40] : memref<8x32xbf16, #tpu.memory_space<vmem>>, vector<8x32xbf16>
      tpu.vector_store %arg13[%c0_39, %c0_40], %79 {strides = array<i32>} : memref<8x32xbf16, #tpu.memory_space<vmem>>, vector<8x32xbf16>,
      %c0_41 = arith.constant 0 : index
      %c0_42 = arith.constant 0 : index
      %81 = vector.load %arg8[%c0_41, %c0_42] : memref<1x32xf32, #tpu.memory_space<vmem>>, vector<1x32xf32>
      %82 = vector.broadcast %81 : vector<1x32xf32> to vector<8x32xf32>
      %83 = arith.addf %54, %82 : vector<8x32xf32>
      %c0_43 = arith.constant 0 : index
      %c0_44 = arith.constant 0 : index
      %c0_45 = arith.constant 0 : index
      %84 = vector.load %arg11[%c0_43, %c0_44, %c0_45] : memref<1x8x32xf32, #tpu.memory_space<vmem>>, vector<1x8x32xf32>
      %85 = vector.shape_cast %84 : vector<1x8x32xf32> to vector<8x32xf32>
      %86 = vector.shape_cast %83 : vector<8x32xf32> to vector<1x8x32xf32>
      tpu.vector_store %arg11[%c0_43, %c0_44, %c0_45], %86 {strides = array<i32>} : memref<1x8x32xf32, #tpu.memory_space<vmem>>, vector<1x8x32xf32>,
      %cst_46 = arith.constant 0.000000e+00 : f32
      %87 = vector.broadcast %cst_46 : f32 to vector<1x8x8xf32>
      %c0_47 = arith.constant 0 : index
      %c0_48 = arith.constant 0 : index
      %c0_49 = arith.constant 0 : index
      %88 = vector.load %arg12[%c0_47, %c0_48, %c0_49] : memref<1x8x8xf32, #tpu.memory_space<vmem>>, vector<1x8x8xf32>
      tpu.vector_store %arg12[%c0_47, %c0_48, %c0_49], %87 {strides = array<i32>} : memref<1x8x8xf32, #tpu.memory_space<vmem>>, vector<1x8x8xf32>,
    } else {
    }
    %c0 = arith.constant 0 : index
    %c0_1 = arith.constant 0 : index
    %3 = vector.load %arg13[%c0, %c0_1] : memref<8x32xbf16, #tpu.memory_space<vmem>>, vector<8x32xbf16>
    %4 = arith.index_cast %arg1 : i32 to index
    %c0_2 = arith.constant 0 : index
    %c0_3 = arith.constant 0 : index
    %5 = vector.load %arg5[%4, %c0_2, %c0_3] : memref<4x32x24xbf16, #tpu.memory_space<vmem>>, vector<1x32x24xbf16>
    %6 = vector.shape_cast %5 : vector<1x32x24xbf16> to vector<32x24xbf16>
    %cst = arith.constant dense<0.000000e+00> : vector<8x24xf32>
    %7 = tpu.matmul %3, %6, %cst {dimension_numbers = #tpu.dot_dimension_numbers<[1], [0], [0], [1], [0, 0, 1, 1], [], []>} : vector<8x32xbf16>, vector<32x24xbf16>, vector<8x24xf32> -> vector<8x24xf32>
    %8 = arith.index_cast %arg1 : i32 to index
    %c0_4 = arith.constant 0 : index
    %c0_5 = arith.constant 0 : index
    %9 = vector.load %arg6[%8, %c0_4, %c0_5] : memref<4x1x24xf32, #tpu.memory_space<vmem>>, vector<1x1x24xf32>
    %10 = vector.shape_cast %9 : vector<1x1x24xf32> to vector<1x24xf32>
    %11 = vector.broadcast %10 : vector<1x24xf32> to vector<8x24xf32>
    %12 = arith.addf %7, %11 : vector<8x24xf32>
    %13 = vector.extract_strided_slice %12 {offsets = [0, 0], sizes = [8, 8], strides = [1, 1]} : vector<8x24xf32> to vector<8x8xf32>
    %14 = arith.truncf %13 : vector<8x8xf32> to vector<8x8xbf16>
    %15 = vector.extract_strided_slice %12 {offsets = [0, 8], sizes = [8, 8], strides = [1, 1]} : vector<8x24xf32> to vector<8x8xf32>
    %16 = arith.truncf %15 : vector<8x8xf32> to vector<8x8xbf16>
    %17 = vector.extract_strided_slice %12 {offsets = [0, 16], sizes = [8, 8], strides = [1, 1]} : vector<8x24xf32> to vector<8x8xf32>
    %18 = arith.truncf %17 : vector<8x8xf32> to vector<8x8xbf16>
    %cst_6 = arith.constant dense<0.000000e+00> : vector<8x8xf32>
    %19 = tpu.matmul %14, %16, %cst_6 {dimension_numbers = #tpu.dot_dimension_numbers<[1], [1], [0], [0], [0, 0, 1, 0], [], []>} : vector<8x8xbf16>, vector<8x8xbf16>, vector<8x8xf32> -> vector<8x8xf32>
    %cst_7 = arith.constant dense<0xFF800000> : vector<8xf32>
    %20 = vector.multi_reduction <maximumf>, %19, %cst_7 [1] : vector<8x8xf32> to vector<8xf32>
    %21 = vector.shape_cast %20 : vector<8xf32> to vector<8x1xf32>
    %22 = vector.broadcast %21 : vector<8x1xf32> to vector<8x8xf32>
    %23 = arith.subf %19, %22 : vector<8x8xf32>
    %24 = math.exp %23 : vector<8x8xf32>
    %cst_8 = arith.constant dense<0.000000e+00> : vector<8xf32>
    %25 = vector.multi_reduction <add>, %24, %cst_8 [1] : vector<8x8xf32> to vector<8xf32>
    %26 = vector.shape_cast %25 : vector<8xf32> to vector<8x1xf32>
    %27 = vector.broadcast %26 : vector<8x1xf32> to vector<8x8xf32>
    %28 = arith.divf %24, %27 : vector<8x8xf32>
    %c0_9 = arith.constant 0 : index
    %c0_10 = arith.constant 0 : index
    %c0_11 = arith.constant 0 : index
    %29 = vector.load %arg12[%c0_9, %c0_10, %c0_11] : memref<1x8x8xf32, #tpu.memory_space<vmem>>, vector<1x8x8xf32>
    %30 = vector.shape_cast %29 : vector<1x8x8xf32> to vector<8x8xf32>
    %cst_12 = arith.constant 2.500000e-01 : f32
    %31 = vector.broadcast %cst_12 : f32 to vector<8x8xf32>
    %32 = arith.mulf %28, %31 : vector<8x8xf32>
    %33 = arith.addf %30, %32 : vector<8x8xf32>
    %c0_13 = arith.constant 0 : index
    %c0_14 = arith.constant 0 : index
    %c0_15 = arith.constant 0 : index
    %34 = vector.load %arg12[%c0_13, %c0_14, %c0_15] : memref<1x8x8xf32, #tpu.memory_space<vmem>>, vector<1x8x8xf32>
    %35 = vector.shape_cast %34 : vector<1x8x8xf32> to vector<8x8xf32>
    %36 = vector.shape_cast %33 : vector<8x8xf32> to vector<1x8x8xf32>
    tpu.vector_store %arg12[%c0_13, %c0_14, %c0_15], %36 {strides = array<i32>} : memref<1x8x8xf32, #tpu.memory_space<vmem>>, vector<1x8x8xf32>,
    %37 = arith.truncf %28 : vector<8x8xf32> to vector<8x8xbf16>
    %cst_16 = arith.constant dense<0.000000e+00> : vector<8x8xf32>
    %38 = tpu.matmul %37, %18, %cst_16 {dimension_numbers = #tpu.dot_dimension_numbers<[1], [0], [0], [1], [0, 0, 1, 1], [], []>} : vector<8x8xbf16>, vector<8x8xbf16>, vector<8x8xf32> -> vector<8x8xf32>
    %c0_17 = arith.constant 0 : index
    %c0_18 = arith.constant 0 : index
    %c0_19 = arith.constant 0 : index
    %39 = vector.load %arg11[%c0_17, %c0_18, %c0_19] : memref<1x8x32xf32, #tpu.memory_space<vmem>>, vector<1x8x32xf32>
    %40 = vector.shape_cast %39 : vector<1x8x32xf32> to vector<8x32xf32>
    %41 = arith.truncf %38 : vector<8x8xf32> to vector<8x8xbf16>
    %42 = arith.index_cast %arg1 : i32 to index
    %c0_20 = arith.constant 0 : index
    %c0_21 = arith.constant 0 : index
    %43 = vector.load %arg7[%42, %c0_20, %c0_21] : memref<4x8x32xbf16, #tpu.memory_space<vmem>>, vector<1x8x32xbf16>
    %44 = vector.shape_cast %43 : vector<1x8x32xbf16> to vector<8x32xbf16>
    %cst_22 = arith.constant dense<0.000000e+00> : vector<8x32xf32>
    %45 = tpu.matmul %41, %44, %cst_22 {dimension_numbers = #tpu.dot_dimension_numbers<[1], [0], [0], [1], [0, 0, 1, 1], [], []>} : vector<8x8xbf16>, vector<8x32xbf16>, vector<8x32xf32> -> vector<8x32xf32>
    %46 = arith.addf %40, %45 : vector<8x32xf32>
    %c0_23 = arith.constant 0 : index
    %c0_24 = arith.constant 0 : index
    %c0_25 = arith.constant 0 : index
    %47 = vector.load %arg11[%c0_23, %c0_24, %c0_25] : memref<1x8x32xf32, #tpu.memory_space<vmem>>, vector<1x8x32xf32>
    %48 = vector.shape_cast %47 : vector<1x8x32xf32> to vector<8x32xf32>
    %49 = vector.shape_cast %46 : vector<8x32xf32> to vector<1x8x32xf32>
    tpu.vector_store %arg11[%c0_23, %c0_24, %c0_25], %49 {strides = array<i32>} : memref<1x8x32xf32, #tpu.memory_space<vmem>>, vector<1x8x32xf32>,
    %c3_i32 = arith.constant 3 : i32
    %50 = arith.cmpi eq, %arg1, %c3_i32 : i32
    %51 = arith.extui %50 : i1 to i32
    %c0_i32_26 = arith.constant 0 : i32
    %52 = arith.cmpi ne, %51, %c0_i32_26 : i32
    scf.if %52 {
      %c0_27 = arith.constant 0 : index
      %c0_28 = arith.constant 0 : index
      %c0_29 = arith.constant 0 : index
      %53 = vector.load %arg11[%c0_27, %c0_28, %c0_29] : memref<1x8x32xf32, #tpu.memory_space<vmem>>, vector<1x8x32xf32>
      %54 = vector.shape_cast %53 : vector<1x8x32xf32> to vector<8x32xf32>
      %cst_30 = arith.constant dense<0.000000e+00> : vector<8xf32>
      %55 = vector.multi_reduction <add>, %54, %cst_30 [1] : vector<8x32xf32> to vector<8xf32>
      %56 = vector.shape_cast %55 : vector<8xf32> to vector<8x1xf32>
      %cst_31 = arith.constant 3.200000e+01 : f32
      %57 = vector.broadcast %cst_31 : f32 to vector<8x1xf32>
      %58 = arith.divf %56, %57 : vector<8x1xf32>
      %59 = vector.broadcast %58 : vector<8x1xf32> to vector<8x32xf32>
      %60 = arith.subf %54, %59 : vector<8x32xf32>
      %61 = arith.mulf %60, %60 : vector<8x32xf32>
      %cst_32 = arith.constant dense<0.000000e+00> : vector<8xf32>
      %62 = vector.multi_reduction <add>, %61, %cst_32 [1] : vector<8x32xf32> to vector<8xf32>
      %63 = vector.shape_cast %62 : vector<8xf32> to vector<8x1xf32>
      %cst_33 = arith.constant 3.200000e+01 : f32
      %64 = vector.broadcast %cst_33 : f32 to vector<8x1xf32>
      %65 = arith.divf %63, %64 : vector<8x1xf32>
      %66 = vector.broadcast %58 : vector<8x1xf32> to vector<8x32xf32>
      %67 = arith.subf %54, %66 : vector<8x32xf32>
      %cst_34 = arith.constant 9.99999974E-6 : f32
      %68 = vector.broadcast %cst_34 : f32 to vector<8x1xf32>
      %69 = arith.addf %65, %68 : vector<8x1xf32>
      %70 = math.rsqrt %69 : vector<8x1xf32>
      %71 = vector.broadcast %70 : vector<8x1xf32> to vector<8x32xf32>
      %72 = arith.mulf %67, %71 : vector<8x32xf32>
      %c0_35 = arith.constant 0 : index
      %c0_36 = arith.constant 0 : index
      %73 = vector.load %arg9[%c0_35, %c0_36] : memref<1x32xf32, #tpu.memory_space<vmem>>, vector<1x32xf32>
      %74 = vector.broadcast %73 : vector<1x32xf32> to vector<8x32xf32>
      %75 = arith.mulf %72, %74 : vector<8x32xf32>
      %c0_37 = arith.constant 0 : index
      %c0_38 = arith.constant 0 : index
      %76 = vector.load %arg10[%c0_37, %c0_38] : memref<1x32xf32, #tpu.memory_space<vmem>>, vector<1x32xf32>
      %77 = vector.broadcast %76 : vector<1x32xf32> to vector<8x32xf32>
      %78 = arith.addf %75, %77 : vector<8x32xf32>
      %c0_39 = arith.constant 0 : index
      %c0_40 = arith.constant 0 : index
      %c0_41 = arith.constant 0 : index
      %79 = vector.load %arg11[%c0_39, %c0_40, %c0_41] : memref<1x8x32xf32, #tpu.memory_space<vmem>>, vector<1x8x32xf32>
      %80 = vector.shape_cast %79 : vector<1x8x32xf32> to vector<8x32xf32>
      %81 = vector.shape_cast %78 : vector<8x32xf32> to vector<1x8x32xf32>
      tpu.vector_store %arg11[%c0_39, %c0_40, %c0_41], %81 {strides = array<i32>} : memref<1x8x32xf32, #tpu.memory_space<vmem>>, vector<1x8x32xf32>,
    } else {
    }
    return
  }
  func.func @transform_0(%arg0: i32, %arg1: i32) -> (i32, i32, i32) {
    %c0_i32 = arith.constant 0 : i32
    %c0_i32_0 = arith.constant 0 : i32
    %c0_i32_1 = arith.constant 0 : i32
    return %arg0, %c0_i32, %c0_i32_0 : i32, i32, i32
  }
  func.func @transform_1(%arg0: i32, %arg1: i32) -> (i32, i32) {
    %c0_i32 = arith.constant 0 : i32
    %c0_i32_0 = arith.constant 0 : i32
    %c0_i32_1 = arith.constant 0 : i32
    return %c0_i32, %c0_i32_0 : i32, i32
  }
  func.func @transform_2(%arg0: i32, %arg1: i32) -> (i32, i32) {
    %c0_i32 = arith.constant 0 : i32
    %c0_i32_0 = arith.constant 0 : i32
    %c0_i32_1 = arith.constant 0 : i32
    return %c0_i32, %c0_i32_0 : i32, i32
  }
  func.func @transform_3(%arg0: i32, %arg1: i32) -> (i32, i32, i32) {
    %c0_i32 = arith.constant 0 : i32
    %c0_i32_0 = arith.constant 0 : i32
    %c0_i32_1 = arith.constant 0 : i32
    %c0_i32_2 = arith.constant 0 : i32
    return %c0_i32, %c0_i32_0, %c0_i32_1 : i32, i32, i32
  }
  func.func @transform_4(%arg0: i32, %arg1: i32) -> (i32, i32, i32) {
    %c0_i32 = arith.constant 0 : i32
    %c0_i32_0 = arith.constant 0 : i32
    %c0_i32_1 = arith.constant 0 : i32
    %c0_i32_2 = arith.constant 0 : i32
    return %c0_i32, %c0_i32_0, %c0_i32_1 : i32, i32, i32
  }
  func.func @transform_5(%arg0: i32, %arg1: i32) -> (i32, i32, i32) {
    %c0_i32 = arith.constant 0 : i32
    %c0_i32_0 = arith.constant 0 : i32
    %c0_i32_1 = arith.constant 0 : i32
    %c0_i32_2 = arith.constant 0 : i32
    return %c0_i32, %c0_i32_0, %c0_i32_1 : i32, i32, i32
  }
  func.func @transform_6(%arg0: i32, %arg1: i32) -> (i32, i32) {
    %c0_i32 = arith.constant 0 : i32
    %c0_i32_0 = arith.constant 0 : i32
    %c0_i32_1 = arith.constant 0 : i32
    return %c0_i32, %c0_i32_0 : i32, i32
  }
  func.func @transform_7(%arg0: i32, %arg1: i32) -> (i32, i32) {
    %c0_i32 = arith.constant 0 : i32
    %c0_i32_0 = arith.constant 0 : i32
    %c0_i32_1 = arith.constant 0 : i32
    return %c0_i32, %c0_i32_0 : i32, i32
  }
  func.func @transform_8(%arg0: i32, %arg1: i32) -> (i32, i32) {
    %c0_i32 = arith.constant 0 : i32
    %c0_i32_0 = arith.constant 0 : i32
    %c0_i32_1 = arith.constant 0 : i32
    return %c0_i32, %c0_i32_0 : i32, i32
  }
  func.func @transform_9(%arg0: i32, %arg1: i32) -> (i32, i32, i32) {
    %c0_i32 = arith.constant 0 : i32
    %c0_i32_0 = arith.constant 0 : i32
    %c0_i32_1 = arith.constant 0 : i32
    return %arg0, %c0_i32, %c0_i32_0 : i32, i32, i32
  }
  func.func @transform_10(%arg0: i32, %arg1: i32) -> (i32, i32, i32) {
    %c0_i32 = arith.constant 0 : i32
    %c0_i32_0 = arith.constant 0 : i32
    %c0_i32_1 = arith.constant 0 : i32
    return %arg0, %c0_i32, %c0_i32_0 : i32, i32, i32
  }
}

module attributes {stable_mosaic.version = 11 : i64} {
  func.func @_encoder_layer_kernel(%arg0: i32, %arg1: i32, %arg2: memref<1x8x32xf32, #tpu.memory_space<vmem>>, %arg3: memref<1x32xf32, #tpu.memory_space<vmem>>, %arg4: memref<1x32xf32, #tpu.memory_space<vmem>>, %arg5: memref<4x32x24xbf16, #tpu.memory_space<vmem>>, %arg6: memref<4x1x24xf32, #tpu.memory_space<vmem>>, %arg7: memref<4x8x32xbf16, #tpu.memory_space<vmem>>, %arg8: memref<1x32xf32, #tpu.memory_space<vmem>>, %arg9: memref<1x32xf32, #tpu.memory_space<vmem>>, %arg10: memref<1x32xf32, #tpu.memory_space<vmem>>, %arg11: memref<1x8x32xf32, #tpu.memory_space<vmem>>, %arg12: memref<1x8x8xf32, #tpu.memory_space<vmem>>, %arg13: memref<8x32xbf16, #tpu.memory_space<vmem>>) attributes {dimension_semantics = [#tpu.dimension_semantics<parallel>, #tpu.dimension_semantics<arbitrary>], iteration_bounds = array<i64: 2, 4>, scalar_prefetch = 0 : i64, scratch_operands = 1 : i64, tpu.core_type = #tpu.core_type<tc>, window_params = [{transform_indices = @transform_0, window_bounds = array<i64: 1, 8, 32>}, {pipeline_mode = #tpu.pipeline_mode<synchronous>, transform_indices = @transform_1, window_bounds = array<i64: 1, 32>}, {pipeline_mode = #tpu.pipeline_mode<synchronous>, transform_indices = @transform_2, window_bounds = array<i64: 1, 32>}, {pipeline_mode = #tpu.pipeline_mode<synchronous>, transform_indices = @transform_3, window_bounds = array<i64: 4, 32, 24>}, {pipeline_mode = #tpu.pipeline_mode<synchronous>, transform_indices = @transform_4, window_bounds = array<i64: 4, 1, 24>}, {pipeline_mode = #tpu.pipeline_mode<synchronous>, transform_indices = @transform_5, window_bounds = array<i64: 4, 8, 32>}, {pipeline_mode = #tpu.pipeline_mode<synchronous>, transform_indices = @transform_6, window_bounds = array<i64: 1, 32>}, {pipeline_mode = #tpu.pipeline_mode<synchronous>, transform_indices = @transform_7, window_bounds = array<i64: 1, 32>}, {pipeline_mode = #tpu.pipeline_mode<synchronous>, transform_indices = @transform_8, window_bounds = array<i64: 1, 32>}, {transform_indices = @transform_9, window_bounds = array<i64: 1, 8, 32>}, {transform_indices = @transform_10, window_bounds = array<i64: 1, 8, 8>}]} {
    %c0_i32 = arith.constant 0 : i32
    %0 = arith.cmpi eq, %arg1, %c0_i32 : i32
    %1 = arith.extui %0 : i1 to i32
    %c0_i32_0 = arith.constant 0 : i32
    %2 = arith.cmpi ne, %1, %c0_i32_0 : i32
    scf.if %2 {
      %c0_26 = arith.constant 0 : index
      %c0_27 = arith.constant 0 : index
      %c0_28 = arith.constant 0 : index
      %50 = vector.load %arg2[%c0_26, %c0_27, %c0_28] : memref<1x8x32xf32, #tpu.memory_space<vmem>>, vector<1x8x32xf32>
      %51 = vector.shape_cast %50 : vector<1x8x32xf32> to vector<8x32xf32>
      %cst_29 = arith.constant dense<0.000000e+00> : vector<8xf32>
      %52 = vector.multi_reduction <add>, %51, %cst_29 [1] : vector<8x32xf32> to vector<8xf32>
      %53 = vector.shape_cast %52 : vector<8xf32> to vector<8x1xf32>
      %cst_30 = arith.constant 3.200000e+01 : f32
      %54 = vector.broadcast %cst_30 : f32 to vector<8x1xf32>
      %55 = arith.divf %53, %54 : vector<8x1xf32>
      %56 = vector.broadcast %55 : vector<8x1xf32> to vector<8x32xf32>
      %57 = arith.subf %51, %56 : vector<8x32xf32>
      %58 = arith.mulf %57, %57 : vector<8x32xf32>
      %cst_31 = arith.constant dense<0.000000e+00> : vector<8xf32>
      %59 = vector.multi_reduction <add>, %58, %cst_31 [1] : vector<8x32xf32> to vector<8xf32>
      %60 = vector.shape_cast %59 : vector<8xf32> to vector<8x1xf32>
      %cst_32 = arith.constant 3.200000e+01 : f32
      %61 = vector.broadcast %cst_32 : f32 to vector<8x1xf32>
      %62 = arith.divf %60, %61 : vector<8x1xf32>
      %63 = vector.broadcast %55 : vector<8x1xf32> to vector<8x32xf32>
      %64 = arith.subf %51, %63 : vector<8x32xf32>
      %cst_33 = arith.constant 9.99999974E-6 : f32
      %65 = vector.broadcast %cst_33 : f32 to vector<8x1xf32>
      %66 = arith.addf %62, %65 : vector<8x1xf32>
      %67 = math.rsqrt %66 : vector<8x1xf32>
      %68 = vector.broadcast %67 : vector<8x1xf32> to vector<8x32xf32>
      %69 = arith.mulf %64, %68 : vector<8x32xf32>
      %c0_34 = arith.constant 0 : index
      %c0_35 = arith.constant 0 : index
      %70 = vector.load %arg3[%c0_34, %c0_35] : memref<1x32xf32, #tpu.memory_space<vmem>>, vector<1x32xf32>
      %71 = vector.broadcast %70 : vector<1x32xf32> to vector<8x32xf32>
      %72 = arith.mulf %69, %71 : vector<8x32xf32>
      %c0_36 = arith.constant 0 : index
      %c0_37 = arith.constant 0 : index
      %73 = vector.load %arg4[%c0_36, %c0_37] : memref<1x32xf32, #tpu.memory_space<vmem>>, vector<1x32xf32>
      %74 = vector.broadcast %73 : vector<1x32xf32> to vector<8x32xf32>
      %75 = arith.addf %72, %74 : vector<8x32xf32>
      %76 = arith.truncf %75 : vector<8x32xf32> to vector<8x32xbf16>
      %c0_38 = arith.constant 0 : index
      %c0_39 = arith.constant 0 : index
      %77 = vector.load %arg13[%c0_38, %c0_39] : memref<8x32xbf16, #tpu.memory_space<vmem>>, vector<8x32xbf16>
      tpu.vector_store %arg13[%c0_38, %c0_39], %76 {strides = array<i32>} : memref<8x32xbf16, #tpu.memory_space<vmem>>, vector<8x32xbf16>,
      %c0_40 = arith.constant 0 : index
      %c0_41 = arith.constant 0 : index
      %78 = vector.load %arg8[%c0_40, %c0_41] : memref<1x32xf32, #tpu.memory_space<vmem>>, vector<1x32xf32>
      %79 = vector.broadcast %78 : vector<1x32xf32> to vector<8x32xf32>
      %80 = arith.addf %51, %79 : vector<8x32xf32>
      %c0_42 = arith.constant 0 : index
      %c0_43 = arith.constant 0 : index
      %c0_44 = arith.constant 0 : index
      %81 = vector.load %arg11[%c0_42, %c0_43, %c0_44] : memref<1x8x32xf32, #tpu.memory_space<vmem>>, vector<1x8x32xf32>
      %82 = vector.shape_cast %81 : vector<1x8x32xf32> to vector<8x32xf32>
      %83 = vector.shape_cast %80 : vector<8x32xf32> to vector<1x8x32xf32>
      tpu.vector_store %arg11[%c0_42, %c0_43, %c0_44], %83 {strides = array<i32>} : memref<1x8x32xf32, #tpu.memory_space<vmem>>, vector<1x8x32xf32>,
      %cst_45 = arith.constant 0.000000e+00 : f32
      %84 = vector.broadcast %cst_45 : f32 to vector<1x8x8xf32>
      %c0_46 = arith.constant 0 : index
      %c0_47 = arith.constant 0 : index
      %c0_48 = arith.constant 0 : index
      %85 = vector.load %arg12[%c0_46, %c0_47, %c0_48] : memref<1x8x8xf32, #tpu.memory_space<vmem>>, vector<1x8x8xf32>
      tpu.vector_store %arg12[%c0_46, %c0_47, %c0_48], %84 {strides = array<i32>} : memref<1x8x8xf32, #tpu.memory_space<vmem>>, vector<1x8x8xf32>,
    } else {
    }
    %c0 = arith.constant 0 : index
    %c0_1 = arith.constant 0 : index
    %3 = vector.load %arg13[%c0, %c0_1] : memref<8x32xbf16, #tpu.memory_space<vmem>>, vector<8x32xbf16>
    %4 = arith.index_cast %arg1 : i32 to index
    %c0_2 = arith.constant 0 : index
    %c0_3 = arith.constant 0 : index
    %5 = vector.load %arg5[%4, %c0_2, %c0_3] : memref<4x32x24xbf16, #tpu.memory_space<vmem>>, vector<1x32x24xbf16>
    %6 = vector.shape_cast %5 : vector<1x32x24xbf16> to vector<32x24xbf16>
    %cst = arith.constant dense<0.000000e+00> : vector<8x24xf32>
    %7 = tpu.matmul %3, %6, %cst {dimension_numbers = #tpu.dot_dimension_numbers<[1], [0], [0], [1], [0, 0, 1, 1], [], []>} : vector<8x32xbf16>, vector<32x24xbf16>, vector<8x24xf32> -> vector<8x24xf32>
    %8 = arith.index_cast %arg1 : i32 to index
    %c0_4 = arith.constant 0 : index
    %c0_5 = arith.constant 0 : index
    %9 = vector.load %arg6[%8, %c0_4, %c0_5] : memref<4x1x24xf32, #tpu.memory_space<vmem>>, vector<1x1x24xf32>
    %10 = vector.shape_cast %9 : vector<1x1x24xf32> to vector<1x24xf32>
    %11 = vector.broadcast %10 : vector<1x24xf32> to vector<8x24xf32>
    %12 = arith.addf %7, %11 : vector<8x24xf32>
    %13 = vector.extract_strided_slice %12 {offsets = [0, 0], sizes = [8, 8], strides = [1, 1]} : vector<8x24xf32> to vector<8x8xf32>
    %14 = arith.truncf %13 : vector<8x8xf32> to vector<8x8xbf16>
    %15 = vector.extract_strided_slice %12 {offsets = [0, 8], sizes = [8, 8], strides = [1, 1]} : vector<8x24xf32> to vector<8x8xf32>
    %16 = arith.truncf %15 : vector<8x8xf32> to vector<8x8xbf16>
    %17 = vector.extract_strided_slice %12 {offsets = [0, 16], sizes = [8, 8], strides = [1, 1]} : vector<8x24xf32> to vector<8x8xf32>
    %18 = arith.truncf %17 : vector<8x8xf32> to vector<8x8xbf16>
    %cst_6 = arith.constant dense<0.000000e+00> : vector<8x8xf32>
    %19 = tpu.matmul %14, %16, %cst_6 {dimension_numbers = #tpu.dot_dimension_numbers<[1], [1], [0], [0], [0, 0, 1, 0], [], []>} : vector<8x8xbf16>, vector<8x8xbf16>, vector<8x8xf32> -> vector<8x8xf32>
    %cst_7 = arith.constant dense<0xFF800000> : vector<8xf32>
    %20 = vector.multi_reduction <maximumf>, %19, %cst_7 [1] : vector<8x8xf32> to vector<8xf32>
    %21 = vector.shape_cast %20 : vector<8xf32> to vector<8x1xf32>
    %22 = vector.broadcast %21 : vector<8x1xf32> to vector<8x8xf32>
    %23 = arith.subf %19, %22 : vector<8x8xf32>
    %24 = math.exp %23 : vector<8x8xf32>
    %cst_8 = arith.constant dense<0.000000e+00> : vector<8xf32>
    %25 = vector.multi_reduction <add>, %24, %cst_8 [1] : vector<8x8xf32> to vector<8xf32>
    %26 = vector.shape_cast %25 : vector<8xf32> to vector<8x1xf32>
    %27 = vector.broadcast %26 : vector<8x1xf32> to vector<8x8xf32>
    %28 = arith.divf %24, %27 : vector<8x8xf32>
    %c0_9 = arith.constant 0 : index
    %c0_10 = arith.constant 0 : index
    %c0_11 = arith.constant 0 : index
    %29 = vector.load %arg12[%c0_9, %c0_10, %c0_11] : memref<1x8x8xf32, #tpu.memory_space<vmem>>, vector<1x8x8xf32>
    %30 = vector.shape_cast %29 : vector<1x8x8xf32> to vector<8x8xf32>
    %cst_12 = arith.constant 2.500000e-01 : f32
    %31 = vector.broadcast %cst_12 : f32 to vector<8x8xf32>
    %32 = arith.mulf %28, %31 : vector<8x8xf32>
    %33 = arith.addf %30, %32 : vector<8x8xf32>
    %c0_13 = arith.constant 0 : index
    %c0_14 = arith.constant 0 : index
    %c0_15 = arith.constant 0 : index
    %34 = vector.load %arg12[%c0_13, %c0_14, %c0_15] : memref<1x8x8xf32, #tpu.memory_space<vmem>>, vector<1x8x8xf32>
    %35 = vector.shape_cast %34 : vector<1x8x8xf32> to vector<8x8xf32>
    %36 = vector.shape_cast %33 : vector<8x8xf32> to vector<1x8x8xf32>
    tpu.vector_store %arg12[%c0_13, %c0_14, %c0_15], %36 {strides = array<i32>} : memref<1x8x8xf32, #tpu.memory_space<vmem>>, vector<1x8x8xf32>,
    %37 = arith.truncf %28 : vector<8x8xf32> to vector<8x8xbf16>
    %cst_16 = arith.constant dense<0.000000e+00> : vector<8x8xf32>
    %38 = tpu.matmul %37, %18, %cst_16 {dimension_numbers = #tpu.dot_dimension_numbers<[1], [0], [0], [1], [0, 0, 1, 1], [], []>} : vector<8x8xbf16>, vector<8x8xbf16>, vector<8x8xf32> -> vector<8x8xf32>
    %c0_17 = arith.constant 0 : index
    %c0_18 = arith.constant 0 : index
    %c0_19 = arith.constant 0 : index
    %39 = vector.load %arg11[%c0_17, %c0_18, %c0_19] : memref<1x8x32xf32, #tpu.memory_space<vmem>>, vector<1x8x32xf32>
    %40 = vector.shape_cast %39 : vector<1x8x32xf32> to vector<8x32xf32>
    %41 = arith.truncf %38 : vector<8x8xf32> to vector<8x8xbf16>
    %42 = arith.index_cast %arg1 : i32 to index
    %c0_20 = arith.constant 0 : index
    %c0_21 = arith.constant 0 : index
    %43 = vector.load %arg7[%42, %c0_20, %c0_21] : memref<4x8x32xbf16, #tpu.memory_space<vmem>>, vector<1x8x32xbf16>
    %44 = vector.shape_cast %43 : vector<1x8x32xbf16> to vector<8x32xbf16>
    %cst_22 = arith.constant dense<0.000000e+00> : vector<8x32xf32>
    %45 = tpu.matmul %41, %44, %cst_22 {dimension_numbers = #tpu.dot_dimension_numbers<[1], [0], [0], [1], [0, 0, 1, 1], [], []>} : vector<8x8xbf16>, vector<8x32xbf16>, vector<8x32xf32> -> vector<8x32xf32>
    %46 = arith.addf %40, %45 : vector<8x32xf32>
    %c0_23 = arith.constant 0 : index
    %c0_24 = arith.constant 0 : index
    %c0_25 = arith.constant 0 : index
    %47 = vector.load %arg11[%c0_23, %c0_24, %c0_25] : memref<1x8x32xf32, #tpu.memory_space<vmem>>, vector<1x8x32xf32>
    %48 = vector.shape_cast %47 : vector<1x8x32xf32> to vector<8x32xf32>
    %49 = vector.shape_cast %46 : vector<8x32xf32> to vector<1x8x32xf32>
    tpu.vector_store %arg11[%c0_23, %c0_24, %c0_25], %49 {strides = array<i32>} : memref<1x8x32xf32, #tpu.memory_space<vmem>>, vector<1x8x32xf32>,
    return
  }
  func.func @transform_0(%arg0: i32, %arg1: i32) -> (i32, i32, i32) {
    %c0_i32 = arith.constant 0 : i32
    %c0_i32_0 = arith.constant 0 : i32
    %c0_i32_1 = arith.constant 0 : i32
    return %arg0, %c0_i32, %c0_i32_0 : i32, i32, i32
  }
  func.func @transform_1(%arg0: i32, %arg1: i32) -> (i32, i32) {
    %c0_i32 = arith.constant 0 : i32
    %c0_i32_0 = arith.constant 0 : i32
    %c0_i32_1 = arith.constant 0 : i32
    return %c0_i32, %c0_i32_0 : i32, i32
  }
  func.func @transform_2(%arg0: i32, %arg1: i32) -> (i32, i32) {
    %c0_i32 = arith.constant 0 : i32
    %c0_i32_0 = arith.constant 0 : i32
    %c0_i32_1 = arith.constant 0 : i32
    return %c0_i32, %c0_i32_0 : i32, i32
  }
  func.func @transform_3(%arg0: i32, %arg1: i32) -> (i32, i32, i32) {
    %c0_i32 = arith.constant 0 : i32
    %c0_i32_0 = arith.constant 0 : i32
    %c0_i32_1 = arith.constant 0 : i32
    %c0_i32_2 = arith.constant 0 : i32
    return %c0_i32, %c0_i32_0, %c0_i32_1 : i32, i32, i32
  }
  func.func @transform_4(%arg0: i32, %arg1: i32) -> (i32, i32, i32) {
    %c0_i32 = arith.constant 0 : i32
    %c0_i32_0 = arith.constant 0 : i32
    %c0_i32_1 = arith.constant 0 : i32
    %c0_i32_2 = arith.constant 0 : i32
    return %c0_i32, %c0_i32_0, %c0_i32_1 : i32, i32, i32
  }
  func.func @transform_5(%arg0: i32, %arg1: i32) -> (i32, i32, i32) {
    %c0_i32 = arith.constant 0 : i32
    %c0_i32_0 = arith.constant 0 : i32
    %c0_i32_1 = arith.constant 0 : i32
    %c0_i32_2 = arith.constant 0 : i32
    return %c0_i32, %c0_i32_0, %c0_i32_1 : i32, i32, i32
  }
  func.func @transform_6(%arg0: i32, %arg1: i32) -> (i32, i32) {
    %c0_i32 = arith.constant 0 : i32
    %c0_i32_0 = arith.constant 0 : i32
    %c0_i32_1 = arith.constant 0 : i32
    return %c0_i32, %c0_i32_0 : i32, i32
  }
  func.func @transform_7(%arg0: i32, %arg1: i32) -> (i32, i32) {
    %c0_i32 = arith.constant 0 : i32
    %c0_i32_0 = arith.constant 0 : i32
    %c0_i32_1 = arith.constant 0 : i32
    return %c0_i32, %c0_i32_0 : i32, i32
  }
  func.func @transform_8(%arg0: i32, %arg1: i32) -> (i32, i32) {
    %c0_i32 = arith.constant 0 : i32
    %c0_i32_0 = arith.constant 0 : i32
    %c0_i32_1 = arith.constant 0 : i32
    return %c0_i32, %c0_i32_0 : i32, i32
  }
  func.func @transform_9(%arg0: i32, %arg1: i32) -> (i32, i32, i32) {
    %c0_i32 = arith.constant 0 : i32
    %c0_i32_0 = arith.constant 0 : i32
    %c0_i32_1 = arith.constant 0 : i32
    return %arg0, %c0_i32, %c0_i32_0 : i32, i32, i32
  }
  func.func @transform_10(%arg0: i32, %arg1: i32) -> (i32, i32, i32) {
    %c0_i32 = arith.constant 0 : i32
    %c0_i32_0 = arith.constant 0 : i32
    %c0_i32_1 = arith.constant 0 : i32
    return %arg0, %c0_i32, %c0_i32_0 : i32, i32, i32
  }
}

</mosaic_0001>

<bundles_post_ra>
// kernel: encoder_forward.3
= control target key start
LH: loop header
LB: loop body
LE: loop exit
PB: predicated region body
PF: predicated region fallthrough
CT: control target
= control target key end

     0   :  { %16 = vsyncpa [#allocation4], 0  ;;  %s1316_s0 = inlined_call_operand.vmem [shape: f32[2,8,32], index: 0, kind: input, shape index: {}]   ;;  %s1317_s1 = inlined_call_operand.vmem [shape: f32[1,32], index: 1, kind: input, shape index: {}]   ;;  %s1318_s2 = inlined_call_operand.vmem [shape: f32[1,32], index: 2, kind: input, shape index: {}]   ;;  %s1319_s3 = inlined_call_operand.vmem [shape: bf16[4,32,24], index: 3, kind: input, shape index: {}]   ;;  %s1320_s4 = inlined_call_operand.vmem [shape: f32[4,1,24], index: 4, kind: input, shape index: {}]   ;;  %s1321_s5 = inlined_call_operand.vmem [shape: bf16[4,8,32], index: 5, kind: input, shape index: {}]   ;;  %s1322_s6 = inlined_call_operand.vmem [shape: f32[1,32], index: 6, kind: input, shape index: {}]   ;;  %s1323_s7 = inlined_call_operand.vmem [shape: f32[1,32], index: 7, kind: input, shape index: {}]   ;;  %s1324_s8 = inlined_call_operand.vmem [shape: f32[1,32], index: 8, kind: input, shape index: {}]   ;;  %s1325_s9 = inlined_call_operand.hbm [shape: f32[2,8,32], index: 9, kind: output, shape index: {0}]   ;;  %s1326_s10 = inlined_call_operand.vmem [shape: f32[2,8,8], index: 10, kind: output, shape index: {1}]  }
   0x1   :  { %18 = vsyncpa [#allocation4 + $0x1], 0  ;;  %s1132_s13 = smov 0   ;;  %s1134_s14 = smov 0  }
   0x2   :  { %s1136_s15 = smov 0   ;;  %s1138_s16 = smov 0  }
   0x3   :  { %s1140_s17 = smov 0   ;;  %s1142_s18 = smov 0  }
   0x4   :  { %s1144_s19 = smov 0   ;;  %s1146_s20 = smov 0  }
   0x5 LB: > { %1331 = sst [smem:[#allocation6_spill]] %s1061_s18  ;;  %s826_s21 = sadd.s32 4294967295, %s1069_s20   ;;  %s1069_s20 = sphi %s1146_s20, %s24_s20   ;;  %s1065_s19 = sphi %s1144_s19, %s1341_s19   ;;  %s1061_s18 = sphi %s1142_s18, %s1340_s18   ;;  %s1057_s17 = sphi %s1140_s17, %s1339_s17   ;;  %s1053_s16 = sphi %s1138_s16, %s1338_s16   ;;  %s1049_s15 = sphi %s1136_s15, %s1344_s15   ;;  %s1045_s14 = sphi %s1134_s14, %s1343_s14   ;;  %s1041_s13 = sphi %s1132_s13, %s1342_s13  }
   0x6   : > { %1332 = sst [smem:[#allocation7_spill]] %s1065_s19  ;;  %s827_s22 = sadd.s32 4294967294, %s1069_s20  }
   0x7   : > { %s33_s23 = sadd.s32 1, %s1061_s18  ;;  %s36_s24 = sadd.s32 1, %s1065_s19 }
   0x8   : > { %p34_p0 = scmp.ge.s32.totalorder %s33_s23, 4  ;;  %p247_p1 = scmp.ne.s32.totalorder %s1049_s15, %s1045_s14 }
   0x9   : > { %p248_p2 = scmp.eq.s32.totalorder %s826_s21, 7  ;;  %p253_p4 = scmp.ne.s32.totalorder %s1045_s14, %s1041_s13 }
   0xa   : > { %s1346_s23 = smov (%p34_p0, %s33_s23), 0  ;;  %s1348_s24 = smov (!%p34_p0, %s36_s24), %s1065_s19 }
   0xb   : > { %1333 = sst [smem:[#allocation8_spill]] %s1346_s23  ;;  %p1181_p3 = por %p248_p2, %p247_p1 }
   0xc   : > { %p38_p5 = scmp.ge.s32.totalorder %s1348_s24, 2  ;;  %p254_p6 = scmp.eq.s32.totalorder %s827_s22, 7 }
   0xd   : > { %p830_p7 = scmp.ge.s32.totalorder %s1069_s20, 1  ;;  %p329_p8 = scmp.lt.s32.totalorder %s1069_s20, 9 }
   0xe   : > { %s1350_s24 = smov (%p38_p5, %s1348_s24), 0  ;;  %p1191_p9 = por %p254_p6, %p253_p4 }
   0xf   : > { %1335 = sst [smem:[#allocation9_spill]] %s1350_s24  ;;  %p330_p10 = pnand %p830_p7, %p329_p8 }
  0x10   : > { %s234_s27 = ssub.s32 %s1065_s19, %s1350_s24  ;;  %s237_s28 = sadd.s32 1, %s1049_s15 }
  0x11   : > { %p235_p11 = scmp.eq.s32.totalorder %s234_s27, 0  ;;  %333 = sbr.rel (%p330_p10) target bundleno = 1908 (0x774), region = 56 }
  0x12   : > { %s1330_s30 = sand.u32 (!%p330_p10), 1, %s1045_s14   ;;  %p370_p12 = scmp.lt.s32.totalorder (!%p330_p10), %s1057_s17, 1 }
  0x13   : > { %s1199_s29 = scalar_select %p235_p11, %s1049_s15, %s237_s28  }
  0x14   : > { %s831_s11 = sshll.u32 (!%p330_p10), %s1330_s30, 3  ;;  %p834_p13 = scmp.ne.s32.totalorder (!%p330_p10), %s1053_s16, 0 }
  0x15   : > { %s1214_s28 = scalar_lea.vmem (!%p330_p10), [#allocation3], %s831_s11 }
  0x16   : > { %s371_s12 = scalar_select %p370_p12, %s1057_s17, 1 }
  0x17   : > { %382 = sbr.rel (%p834_p13) target bundleno = 340 (0x154), region = 60 }
  0x18   : > { %s832_s21 = sshll.u32 %s371_s12, 3 }
  0x19   : > { %s373_s18 = scalar_lea.vmem %s1316_s0, %s832_s21  ;;  %s1212_s27 = scalar_lea.vmem %s1326_s10, %s832_s21 }
  0x1c   : > { %v383_v0 = vld [vmem:[%s373_s18] sm:$0xff]  ;;  %vm384_vm0 = vcmask 261120   ;;  %vm427_vm1 = vcmask 64512   ;;  %v1071_v9 = vmov 0.0   ;;  %vm416_vm2 = vcmask 257024  }
  0x1d   : > { %v837_v1 = vld [vmem:[%s1322_s6] ss:$0 sm:$0xff]  ;;  %v385_v2 = vsel %vm384_vm0, %v383_v0, 0.0  ;;  %428 = vst.msk [vmem:[%s1212_s27] sm:$0xff] %vm427_vm1, %v1071_v9 }
  0x1e   : > { %v425_v3 = vadd.f32 %v837_v1, %v383_v0  ;;  %386 = vadd.xlane.f32.xlu0 %v385_v2  ;;  %v835_v14 = vld [vmem:[%s1317_s1] ss:$0 sm:$0xff] }
  0x1f   : > { %v836_v16 = vld [vmem:[%s1318_s2] ss:$0 sm:$0xff] }
  0x20   : > { %426 = vst.msk [vmem:[%s1214_s28] sm:$0xff] %vm384_vm0, %v425_v3 }
  0xa7   : > { %v387_v4 = vpop.xlane.xlu0 %386 }
  0xa8   : > { %v389_v5 = vmul.f32 0.03125, %v387_v4 }
  0xaa   : > { %v390_v6 = vsub.f32 %v383_v0, %v389_v5 }
  0xac   : > { %v391_v7 = vmul.f32 %v390_v6, %v390_v6 }
  0xae   : > { %v392_v8 = vsel %vm384_vm0, %v391_v7, 0.0 }
  0xaf   : > { %393 = vadd.xlane.f32.xlu0 %v392_v8 }
 0x138   : > { %v394_v10 = vpop.xlane.xlu0 %393 }
 0x139   : > { %v395_v11 = vmul.f32 0.03125, %v394_v10 }
 0x13b   : > { %v396_v12 = vadd.f32 1e-05, %v395_v11 }
 0x13d   : > { %967 = vrsqrt.f32 %v396_v12 }
 0x14a   : > { %v968_v13 = vpop.eup %967 }
 0x14b   : > { %v398_v15 = vmul.f32 %v968_v13, %v390_v6 }
 0x14d   : > { %v406_v17 = vmul.f32 %v835_v14, %v398_v15 }
 0x14f   : > { %v414_v18 = vadd.f32 %v836_v16, %v406_v17 }
 0x151   : > { %v415_v19 = vpack.c.bf16 %v414_v18, %v414_v18 }
 0x153   : > { %417 = vst.msk [vmem:[#allocation2] sm:$0xf] %vm416_vm2, %v415_v19 }
 0x154 PF: > { %s855_s30 = sshll.u32 %s1053_s16, 4  ;;  %v1072_v20 = vmov 0.0   ;;  %vm1073_vm3 = vmmov 0   ;;  %vm457_vm4 = vcmask 261120   ;;  %s437_s19 = scalar_lea.vmem %s1320_s4, %s1053_s16  ;;  %vm505_vm5 = vcmask 64512   ;;  %v563_v50 = vld [vmem:[%s1212_s27] sm:$0xff] }
 0x155   : > { %865 = vmatprep.subr.bf16.mxu0 %v1072_v20  ;;  %s432_s22 = scalar_lea.vmem %s1319_s3, %s855_s30  ;;  %869 = vmatprep.mubr.msk.bf16.mxu0 %vm1073_vm3, %v1072_v20  ;;  %v840_v24 = vld [vmem:[%s437_s19] ss:$0 sm:$0xff]  ;;  %s1074_s23 = smov 120   ;;  %vm573_vm6 = vcmask 1043456   ;;  %v617_v59 = vld [vmem:[%s1214_s28] sm:$0xff] }
 0x156   : > { %v969_v21 = vld [vmem:[%s432_s22 + $0x8] sm:$0xff]   ;;  %873 = vmatprep.subr.bf16.mxu1 %v1072_v20  ;;  %875 = vmatprep.mubr.msk.bf16.mxu1 %vm1073_vm3, %v1072_v20  ;;  %v970_v22 = vld [vmem:[%s432_s22] sm:$0xff]   ;;  %s846_s24 = sshll.u32 %s1053_s16, 2  ;;  %s1075_s22 = smov 112  }
 0x157   : > { %866 = vmatpush3.bf16.msra.mxu0 %v969_v21  ;;  %s620_s21 = scalar_lea.vmem %s1321_s5, %s846_s24  ;;  %p848_p0 = scmp.ne.s32.totalorder %s1053_s16, 3 }
 0x158   : > { %867 = vmatprep.subr.bf16.mxu0 %v1072_v20  ;;  %v621_v43 = vld [vmem:[%s620_s21] sm:$0xf] }
 0x159   : > { %v626_v44 = vsel %vm573_vm6, %v621_v43, 0 }
 0x15a   : > { %v429_v23 = vld [vmem:[#allocation2] sm:$0xf] }
 0x15b   : > { %868 = vmatpush3.bf16.msra.mxu0 %v970_v22 }
 0x15c   : > { %879 = vmatprep.subr.bf16.mxu0 %v1072_v20 }
 0x15e   : > { %870 = vmatmul.mubr.msk.bf16.vlgmr.msra.gmra.mxu0 %vm457_vm4, %v429_v23 }
 0x15f   : > { %881 = vmatprep.mubr.msk.bf16.mxu0 %vm1073_vm3, %v1072_v20 }
 0x21e   : > { %v495_v25 = vpop.f32.mrf.mxu0 }
 0x21f   : > { %v496_v26 = vadd.f32 %v840_v24, %v495_v25 }
 0x220   : > { %v871_v27 = vpop.f32.mrf.mxu0 }
 0x221   : > { %v501_v28 = vpack.c.bf16 %v496_v26, %v496_v26 }
 0x222   : > { %v498_v29 = vpop.f32.mrf.mxu0 }
 0x223   : > { %503 = vrot.lane.b32.xlu0 %v501_v28, %s1074_s23 }
 0x224   : > { %v872_v30 = vpop.f32.mrf.mxu0 }
 0x295   : > { %v504_v31 = vpop.permute.xlu0 %503 }
 0x296   : > { %v510_v32 = vsel %vm505_vm5, %v504_v31, 0 }
 0x297   : > { %874 = vmatpush3.bf16.xpose.msra.mxu1 %v510_v32 }
 0x298   : > { %885 = vmatprep.subr.bf16.mxu1 %v1072_v20 }
 0x29e   : > { %876 = vmatmul.mubr.msk.bf16.vlgmr.msra.gmra.mxu1 %vm505_vm5, %v501_v28 }
 0x29f   : > { %887 = vmatprep.mubr.msk.bf16.mxu1 %vm1073_vm3, %v1072_v20  ;;  %886 = vmatpush3.bf16.msra.mxu1 %v626_v44 }
 0x35e   : > { %v546_v33 = vpop.f32.mrf.mxu1 }
 0x35f   : > { %v552_v34 = vsel %vm505_vm5, %v546_v33, -inf }
 0x360   : > { %553 = vmax.xlane.f32.xlu0 %v552_v34  ;;  %v877_v35 = vpop.f32.mrf.mxu1 }
 0x362   : > { %v549_v36 = vpop.f32.mrf.mxu1 }
 0x364   : > { %v878_v37 = vpop.f32.mrf.mxu1 }
 0x3e9   : > { %v554_v38 = vpop.xlane.xlu0 %553 }
 0x3ea   : > { %v555_v39 = vsub.f32 %v546_v33, %v554_v38 }
 0x3ec   : > { %v556_v40 = vmul.f32 1.442695, %v555_v39 }
 0x3ee   : > { %971 = vpow2.f32 %v556_v40 }
 0x3fb   : > { %v972_v41 = vpop.eup %971 }
 0x3fc   : > { %v558_v42 = vsel %vm505_vm5, %v972_v41, 0.0 }
 0x3fd   : > { %559 = vadd.xlane.f32.xlu1 %v558_v42 }
 0x40e   : > { %568 = vrot.lane.b32.xlu1 %v501_v28, %s1075_s22 }
 0x486   : > { %v560_v45 = vpop.xlane.xlu1 %559 }
 0x487   : > { %973 = vrcp.f32 %v560_v45 }
 0x48a   : > { %v569_v46 = vpop.permute.xlu1 %568 }
 0x48b   : > { %v575_v47 = vsel %vm573_vm6, %v569_v46, 0 }
 0x48c   : > { %880 = vmatpush3.bf16.msra.mxu0 %v575_v47 }
 0x494   : > { %v974_v48 = vpop.eup %973 }
 0x495   : > { %v562_v49 = vmul.f32 %v974_v48, %v972_v41 }
 0x497   : > { %v564_v51 = vmul.f32 0.25, %v562_v49  ;;  %v567_v52 = vpack.c.bf16 %v562_v49, %v562_v49 }
 0x499   : > { %v565_v53 = vadd.f32 %v564_v51, %v563_v50  ;;  %882 = vmatmul.mubr.msk.bf16.vlgmr.msra.gmra.mxu0 %vm505_vm5, %v567_v52 }
 0x49b   : > { %566 = vst.msk [vmem:[%s1212_s27] sm:$0xff] %vm505_vm5, %v565_v53 }
 0x559   : > { %v611_v54 = vpop.f32.mrf.mxu0 }
 0x55a   : > { %v618_v55 = vpack.c.bf16 %v611_v54, %v611_v54 }
 0x55b   : > { %v883_v56 = vpop.f32.mrf.mxu0 }
 0x55c   : > { %888 = vmatmul.mubr.msk.bf16.vlgmr.msra.gmra.mxu1 %vm505_vm5, %v618_v55 }
 0x55d   : > { %v614_v57 = vpop.f32.mrf.mxu0 }
 0x55f   : > { %v884_v58 = vpop.f32.mrf.mxu0 }
 0x61c   : > { %v662_v60 = vpop.f32.mrf.mxu1 }
 0x61d   : > { %v668_v61 = vadd.f32 %v662_v60, %v617_v59 }
 0x61e   : > { %v889_v62 = vpop.f32.mrf.mxu1  ;;  %673 = sbr.rel (%p848_p0) target bundleno = 1884 (0x75c), region = 64 }
 0x61f   : > { %669 = vst.msk [vmem:[%s1214_s28] sm:$0xff] %vm457_vm4, %v668_v61 }
 0x620   : > { %v665_v63 = vpop.f32.mrf.mxu1 }
 0x622   : > { %v890_v0 = vpop.f32.mrf.mxu1 }
 0x623   : > { %v849_v12 = vld [vmem:[%s1323_s7] ss:$0 sm:$0xff] }
 0x624   : > { %v850_v14 = vld [vmem:[%s1324_s8] ss:$0 sm:$0xff] }
 0x626   : > { %v674_v1 = vld [vmem:[%s1214_s28] sm:$0xff] }
 0x627   : > { %v675_v2 = vsel %vm457_vm4, %v674_v1, 0.0 }
 0x628   : > { %676 = vadd.xlane.f32.xlu0 %v675_v2 }
 0x6b1   : > { %v677_v3 = vpop.xlane.xlu0 %676 }
 0x6b2   : > { %v679_v4 = vmul.f32 0.03125, %v677_v3 }
 0x6b4   : > { %v680_v5 = vsub.f32 %v674_v1, %v679_v4 }
 0x6b6   : > { %v681_v6 = vmul.f32 %v680_v5, %v680_v5 }
 0x6b8   : > { %v682_v7 = vsel %vm457_vm4, %v681_v6, 0.0 }
 0x6b9   : > { %683 = vadd.xlane.f32.xlu0 %v682_v7 }
 0x742   : > { %v684_v8 = vpop.xlane.xlu0 %683 }
 0x743   : > { %v685_v9 = vmul.f32 0.03125, %v684_v8 }
 0x745   : > { %v686_v10 = vadd.f32 1e-05, %v685_v9 }
 0x747   : > { %975 = vrsqrt.f32 %v686_v10 }
 0x754   : > { %v976_v11 = vpop.eup %975 }
 0x755   : > { %v688_v13 = vmul.f32 %v976_v11, %v680_v5 }
 0x757   : > { %v696_v15 = vmul.f32 %v849_v12, %v688_v13 }
 0x759   : > { %v704_v16 = vadd.f32 %v850_v14, %v696_v15 }
 0x75b   : > { %705 = vst.msk [vmem:[%s1214_s28] sm:$0xff] %vm457_vm4, %v704_v16 }
 0x75c PF: > { %s852_s19 = sshll.u32 %s1057_s17, 7  ;;  %s724_s11 = sshll.u32 %s1214_s28, 4  ;;  %s725_s11 = int_to_ptr.vmem [resolvable:$true] %s724_s11 }
 0x75d   : > { %s722_s30 = scalar_lea.hbm %s1325_s9, %s852_s19  ;;  %s1337_s21 = sand.u32 1, %s1045_s14  }
 0x75e   : > { %s707_s22 = scalar_lea.sflag [#allocation4], %s1337_s21  ;;  %s977_s16 = scalar_lea.vmem %s725_s11, 128 }
 0x75f   : > { %p978_p1 = scmp.ne.s32.totalorder %s725_s11, %s977_s16  ;;  %s1076_s27 = smov [#allocation3]  }
 0x760   : > { %s981_s12 = sshll.u32 %s1076_s27, 4  ;;  %s982_s12 = int_to_ptr.vmem [resolvable:$false] %s981_s12 }
 0x761   : > { %p979_p2 = pnand %p978_p1, %p1181_p3  ;;  %s983_s18 = scalar_lea.vmem %s982_s12, 256 }
 0x762   : > { %p984_p5 = scmp.lt.s32.totalorder %s725_s11, %s982_s12  ;;  %p985_p6 = scmp.lt.s32.totalorder %s983_s18, %s977_s16 }
 0x763   : > { %p980_p4 = pneg %p979_p2 }
 0x764   : > { %p986_p7 = por %p985_p6, %p984_p5 }
 0x766   : > { %p987_p8 = pnand %p986_p7, %p980_p4 }
 0x768   : > { %990 = shalt.err (!%p987_p8)
}
 0x769   : > { %s991_s17 = scalar_lea.hbm %s722_s30, 128  ;;  %s995_s23 = scalar_lea.hbm %s1325_s9, 256 }
 0x76a   : > { %p992_p10 = scmp.ne.s32.totalorder %s722_s30, %s991_s17  ;;  %p996_p13 = scmp.lt.s32.totalorder %s722_s30, %s1325_s9 }
 0x76b   : > { %p997_p0 = scmp.lt.s32.totalorder %s995_s23, %s991_s17 }
 0x76c   : > { %p993_p11 = pnand %p992_p10, %p1181_p3 }
 0x76d   : > { %p998_p1 = por %p997_p0, %p996_p13 }
 0x76e   : > { %p994_p12 = pneg %p993_p11 }
 0x770   : > { %p999_p2 = pnand %p998_p1, %p994_p12 }
 0x772   : > { %1002 = shalt.err (!%p999_p2)
}
 0x773   : > { %891 = dma.vmem_to_hbm [thread:$0]  (%p1181_p3), %s725_s11, 128, %s722_s30, %s707_s22  }
 0x774 PF: > { %p897_p4 = scmp.ge.s32.totalorder %s1069_s20, 2  ;;  %s739_s16 = sand.u32 1, %s1041_s13  }
 0x775   : > { %s740_s27 = scalar_lea.sflag [#allocation4], %s739_s16 }
 0x776   : > { %p894_p5 = pnand %p897_p4, %p1191_p9 }
 0x778   : > { %p895_p6 = pneg %p894_p5 }
 0x77a   : > { %1036 = dma.done.wait (%p895_p6), %s740_s27, 128  }
 0x77b   : > { %1038 = vsyncadd (%p895_p6), %s740_s27, 4294967168  ;;  %s24_s20 = sadd.s32 1, %s1069_s20   ;;  %s1338_s16 = sld [smem:[#allocation6_spill]] }
 0x77c   : > { %p21_p7 = scmp.ge.s32.totalorder %s24_s20, 10   ;;  %s1339_s17 = sld [smem:[#allocation7_spill]] }
 0x77d   : > { %s1340_s18 = sld [smem:[#allocation8_spill]]  ;;  %s1342_s13 = smov %s1045_s14 }
 0x77e   : > { %s1341_s19 = sld [smem:[#allocation9_spill]]  ;;  %s1343_s14 = smov %s1049_s15 }
 0x77f   : > { %s1344_s15 = smov %s1199_s29  ;;  %23 = sbr.rel (!%p21_p7) target bundleno = 5 (0x5), region = 114 }
 0x784   :  { %752 = vsyncpa [#allocation4], 1 }
 0x785   :  { %754 = vsyncpa [#allocation4 + $0x1], 1 }

// kernel: encoder_forward.2
= control target key start
LH: loop header
LB: loop body
LE: loop exit
PB: predicated region body
PF: predicated region fallthrough
CT: control target
= control target key end

     0   :  { %s983_s13 = smov 0   ;;  %s985_s14 = smov 0   ;;  %s1084_s0 = inlined_call_operand.vmem [shape: f32[2,8,32], index: 0, kind: input, shape index: {}]   ;;  %s1085_s1 = inlined_call_operand.vmem [shape: f32[1,32], index: 1, kind: input, shape index: {}]   ;;  %s1086_s2 = inlined_call_operand.vmem [shape: f32[1,32], index: 2, kind: input, shape index: {}]   ;;  %s1087_s3 = inlined_call_operand.vmem [shape: bf16[4,32,24], index: 3, kind: input, shape index: {}]   ;;  %s1088_s4 = inlined_call_operand.vmem [shape: f32[4,1,24], index: 4, kind: input, shape index: {}]   ;;  %s1089_s5 = inlined_call_operand.vmem [shape: bf16[4,8,32], index: 5, kind: input, shape index: {}]   ;;  %s1090_s6 = inlined_call_operand.vmem [shape: f32[1,32], index: 6, kind: input, shape index: {}]   ;;  %s1091_s7 = inlined_call_operand.vmem [shape: f32[1,32], index: 7, kind: input, shape index: {}]   ;;  %s1092_s8 = inlined_call_operand.vmem [shape: f32[1,32], index: 8, kind: input, shape index: {}]   ;;  %s1093_s9 = inlined_call_operand.vmem [shape: f32[2,8,32], index: 9, kind: output, shape index: {0}]   ;;  %s1094_s10 = inlined_call_operand.vmem [shape: f32[2,8,8], index: 10, kind: output, shape index: {1}]  }
   0x1   :  { %s987_s15 = smov 0   ;;  %s989_s16 = smov 0  }
   0x2   :  { %s991_s17 = smov 0  }
   0x3 LB: > { %s30_s7 = sadd.s32 1, %s913_s15  ;;  %s33_s8 = sadd.s32 1, %s917_s16  ;;  %s921_s17 = sphi %s991_s17, %s21_s17   ;;  %s917_s16 = sphi %s989_s16, %s1098_s16   ;;  %s913_s15 = sphi %s987_s15, %s1097_s15   ;;  %s909_s14 = sphi %s985_s14, %s1096_s14   ;;  %s905_s13 = sphi %s983_s13, %s1095_s13  }
   0x4   : > { %p31_p0 = scmp.ge.s32.totalorder %s30_s7, 4  ;;  %p774_p1 = scmp.ge.s32.totalorder %s921_s17, 1 }
   0x5   : > { %p326_p2 = scmp.lt.s32.totalorder %s921_s17, 9 }
   0x6   : > { %s1100_s7 = smov (%p31_p0, %s30_s7), 0  ;;  %s1102_s8 = smov (!%p31_p0, %s33_s8), %s917_s16 }
   0x7   : > { %p327_p3 = pnand %p774_p1, %p326_p2  ;;  %p35_p4 = scmp.ge.s32.totalorder %s1102_s8, 2 }
   0x8   : > { %p366_p5 = scmp.lt.s32.totalorder (!%p327_p3), %s909_s14, 1  ;;  %p778_p6 = scmp.ne.s32.totalorder (!%p327_p3), %s905_s13, 0 }
   0x9   : > { %s1104_s8 = smov (%p35_p4, %s1102_s8), 0  ;;  %330 = sbr.rel (%p327_p3) target bundleno = 1562 (0x61a), region = 56 }
   0xe   : > { %s1106_s14 = smov (!%p366_p5, %s909_s14), 1  ;;  %382 = sbr.rel (%p778_p6) target bundleno = 331 (0x14b), region = 60 }
   0xf   : > { %s775_s18 = sshll.u32 %s1106_s14, 3 }
  0x10   : > { %s369_s21 = scalar_lea.vmem %s1084_s0, %s775_s18  ;;  %s1021_s24 = scalar_lea.vmem %s1093_s9, %s775_s18 }
  0x11   : > { %s1026_s27 = scalar_lea.vmem %s1094_s10, %s775_s18 }
  0x13   : > { %v383_v0 = vld [vmem:[%s369_s21] sm:$0xff]  ;;  %vm384_vm0 = vcmask 261120   ;;  %vm427_vm1 = vcmask 64512   ;;  %v923_v9 = vmov 0.0   ;;  %vm416_vm2 = vcmask 257024  }
  0x14   : > { %v781_v1 = vld [vmem:[%s1090_s6] ss:$0 sm:$0xff]  ;;  %v385_v2 = vsel %vm384_vm0, %v383_v0, 0.0  ;;  %428 = vst.msk [vmem:[%s1026_s27] sm:$0xff] %vm427_vm1, %v923_v9 }
  0x15   : > { %v425_v3 = vadd.f32 %v781_v1, %v383_v0  ;;  %386 = vadd.xlane.f32.xlu0 %v385_v2  ;;  %v779_v14 = vld [vmem:[%s1085_s1] ss:$0 sm:$0xff] }
  0x16   : > { %v780_v16 = vld [vmem:[%s1086_s2] ss:$0 sm:$0xff] }
  0x17   : > { %426 = vst.msk [vmem:[%s1021_s24] sm:$0xff] %vm384_vm0, %v425_v3 }
  0x9e   : > { %v387_v4 = vpop.xlane.xlu0 %386 }
  0x9f   : > { %v389_v5 = vmul.f32 0.03125, %v387_v4 }
  0xa1   : > { %v390_v6 = vsub.f32 %v383_v0, %v389_v5 }
  0xa3   : > { %v391_v7 = vmul.f32 %v390_v6, %v390_v6 }
  0xa5   : > { %v392_v8 = vsel %vm384_vm0, %v391_v7, 0.0 }
  0xa6   : > { %393 = vadd.xlane.f32.xlu0 %v392_v8 }
 0x12f   : > { %v394_v10 = vpop.xlane.xlu0 %393 }
 0x130   : > { %v395_v11 = vmul.f32 0.03125, %v394_v10 }
 0x132   : > { %v396_v12 = vadd.f32 1e-05, %v395_v11 }
 0x134   : > { %875 = vrsqrt.f32 %v396_v12 }
 0x141   : > { %v876_v13 = vpop.eup %875 }
 0x142   : > { %v398_v15 = vmul.f32 %v876_v13, %v390_v6 }
 0x144   : > { %v406_v17 = vmul.f32 %v779_v14, %v398_v15 }
 0x146   : > { %v414_v18 = vadd.f32 %v780_v16, %v406_v17 }
 0x148   : > { %v415_v19 = vpack.c.bf16 %v414_v18, %v414_v18 }
 0x14a   : > { %417 = vst.msk [vmem:[#allocation2] sm:$0xf] %vm416_vm2, %v415_v19 }
 0x14b PF: > { %s794_s18 = sshll.u32 %s905_s13, 4  ;;  %v924_v20 = vmov 0.0   ;;  %vm925_vm3 = vmmov 0   ;;  %vm457_vm4 = vcmask 261120   ;;  %s437_s25 = scalar_lea.vmem %s1088_s4, %s905_s13  ;;  %vm505_vm5 = vcmask 64512   ;;  %v563_v50 = vld [vmem:[%s1026_s27] sm:$0xff] }
 0x14c   : > { %804 = vmatprep.subr.bf16.mxu0 %v924_v20  ;;  %s432_s21 = scalar_lea.vmem %s1087_s3, %s794_s18  ;;  %808 = vmatprep.mubr.msk.bf16.mxu0 %vm925_vm3, %v924_v20  ;;  %v784_v24 = vld [vmem:[%s437_s25] ss:$0 sm:$0xff]  ;;  %s926_s26 = smov 120   ;;  %vm573_vm6 = vcmask 1043456  }
 0x14d   : > { %v877_v21 = vld [vmem:[%s432_s21 + $0x8] sm:$0xff]   ;;  %812 = vmatprep.subr.bf16.mxu1 %v924_v20  ;;  %814 = vmatprep.mubr.msk.bf16.mxu1 %vm925_vm3, %v924_v20  ;;  %v878_v22 = vld [vmem:[%s432_s21] sm:$0xff]   ;;  %s790_s28 = sshll.u32 %s905_s13, 2  ;;  %s927_s12 = smov 112  }
 0x14e   : > { %805 = vmatpush3.bf16.msra.mxu0 %v877_v21  ;;  %s620_s11 = scalar_lea.vmem %s1089_s5, %s790_s28  ;;  %v617_v59 = vld [vmem:[%s1021_s24] sm:$0xff] }
 0x14f   : > { %806 = vmatprep.subr.bf16.mxu0 %v924_v20  ;;  %v621_v43 = vld [vmem:[%s620_s11] sm:$0xf] }
 0x150   : > { %v626_v44 = vsel %vm573_vm6, %v621_v43, 0 }
 0x151   : > { %v429_v23 = vld [vmem:[#allocation2] sm:$0xf] }
 0x152   : > { %807 = vmatpush3.bf16.msra.mxu0 %v878_v22 }
 0x153   : > { %818 = vmatprep.subr.bf16.mxu0 %v924_v20 }
 0x155   : > { %809 = vmatmul.mubr.msk.bf16.vlgmr.msra.gmra.mxu0 %vm457_vm4, %v429_v23 }
 0x156   : > { %820 = vmatprep.mubr.msk.bf16.mxu0 %vm925_vm3, %v924_v20 }
 0x215   : > { %v495_v25 = vpop.f32.mrf.mxu0 }
 0x216   : > { %v496_v26 = vadd.f32 %v784_v24, %v495_v25 }
 0x217   : > { %v810_v27 = vpop.f32.mrf.mxu0 }
 0x218   : > { %v501_v28 = vpack.c.bf16 %v496_v26, %v496_v26 }
 0x219   : > { %v498_v29 = vpop.f32.mrf.mxu0 }
 0x21a   : > { %503 = vrot.lane.b32.xlu0 %v501_v28, %s926_s26 }
 0x21b   : > { %v811_v30 = vpop.f32.mrf.mxu0 }
 0x28c   : > { %v504_v31 = vpop.permute.xlu0 %503 }
 0x28d   : > { %v510_v32 = vsel %vm505_vm5, %v504_v31, 0 }
 0x28e   : > { %813 = vmatpush3.bf16.xpose.msra.mxu1 %v510_v32 }
 0x28f   : > { %824 = vmatprep.subr.bf16.mxu1 %v924_v20 }
 0x295   : > { %815 = vmatmul.mubr.msk.bf16.vlgmr.msra.gmra.mxu1 %vm505_vm5, %v501_v28 }
 0x296   : > { %826 = vmatprep.mubr.msk.bf16.mxu1 %vm925_vm3, %v924_v20  ;;  %825 = vmatpush3.bf16.msra.mxu1 %v626_v44 }
 0x355   : > { %v546_v33 = vpop.f32.mrf.mxu1 }
 0x356   : > { %v552_v34 = vsel %vm505_vm5, %v546_v33, -inf }
 0x357   : > { %553 = vmax.xlane.f32.xlu0 %v552_v34  ;;  %v816_v35 = vpop.f32.mrf.mxu1 }
 0x359   : > { %v549_v36 = vpop.f32.mrf.mxu1 }
 0x35b   : > { %v817_v37 = vpop.f32.mrf.mxu1 }
 0x3e0   : > { %v554_v38 = vpop.xlane.xlu0 %553 }
 0x3e1   : > { %v555_v39 = vsub.f32 %v546_v33, %v554_v38 }
 0x3e3   : > { %v556_v40 = vmul.f32 1.442695, %v555_v39 }
 0x3e5   : > { %879 = vpow2.f32 %v556_v40 }
 0x3f2   : > { %v880_v41 = vpop.eup %879 }
 0x3f3   : > { %v558_v42 = vsel %vm505_vm5, %v880_v41, 0.0 }
 0x3f4   : > { %559 = vadd.xlane.f32.xlu1 %v558_v42 }
 0x405   : > { %568 = vrot.lane.b32.xlu1 %v501_v28, %s927_s12 }
 0x47d   : > { %v560_v45 = vpop.xlane.xlu1 %559 }
 0x47e   : > { %881 = vrcp.f32 %v560_v45 }
 0x481   : > { %v569_v46 = vpop.permute.xlu1 %568 }
 0x482   : > { %v575_v47 = vsel %vm573_vm6, %v569_v46, 0 }
 0x483   : > { %819 = vmatpush3.bf16.msra.mxu0 %v575_v47 }
 0x48b   : > { %v882_v48 = vpop.eup %881 }
 0x48c   : > { %v562_v49 = vmul.f32 %v882_v48, %v880_v41 }
 0x48e   : > { %v564_v51 = vmul.f32 0.25, %v562_v49  ;;  %v567_v52 = vpack.c.bf16 %v562_v49, %v562_v49 }
 0x490   : > { %v565_v53 = vadd.f32 %v564_v51, %v563_v50  ;;  %821 = vmatmul.mubr.msk.bf16.vlgmr.msra.gmra.mxu0 %vm505_vm5, %v567_v52 }
 0x492   : > { %566 = vst.msk [vmem:[%s1026_s27] sm:$0xff] %vm505_vm5, %v565_v53 }
 0x550   : > { %v611_v54 = vpop.f32.mrf.mxu0 }
 0x551   : > { %v618_v55 = vpack.c.bf16 %v611_v54, %v611_v54 }
 0x552   : > { %v822_v56 = vpop.f32.mrf.mxu0 }
 0x553   : > { %827 = vmatmul.mubr.msk.bf16.vlgmr.msra.gmra.mxu1 %vm505_vm5, %v618_v55 }
 0x554   : > { %v614_v57 = vpop.f32.mrf.mxu0 }
 0x556   : > { %v823_v58 = vpop.f32.mrf.mxu0 }
 0x613   : > { %v662_v60 = vpop.f32.mrf.mxu1 }
 0x614   : > { %v668_v61 = vadd.f32 %v662_v60, %v617_v59 }
 0x615   : > { %v828_v62 = vpop.f32.mrf.mxu1 }
 0x616   : > { %669 = vst.msk [vmem:[%s1021_s24] sm:$0xff] %vm457_vm4, %v668_v61 }
 0x617   : > { %v665_v63 = vpop.f32.mrf.mxu1 }
 0x619   : > { %v829_v0 = vpop.f32.mrf.mxu1 }
 0x61a PF: > { %s21_s17 = sadd.s32 1, %s921_s17   ;;  %s1095_s13 = smov %s913_s15 }
 0x61b   : > { %p18_p7 = scmp.ge.s32.totalorder %s21_s17, 10   ;;  %s1096_s14 = smov %s917_s16 }
 0x61c   : > { %s1097_s15 = smov %s1100_s7  ;;  %s1098_s16 = smov %s1104_s8 }
 0x61d   :  { %20 = sbr.rel (!%p18_p7) target bundleno = 3 (0x3), region = 105 }

</bundles_post_ra>
